<compile_context>
chip_gen: v5e
topology: v5e:2x2
jax: 0.10.0
libtpu: 0.0.40
codegen_flags: <defaults>
</compile_context>

<pallas_src>
import functools
import math

import jax
import jax.numpy as jnp
import numpy as np
from jax.experimental import pallas as pl
from jax.experimental.pallas import tpu as pltpu

# Above the default scoped-VMEM limits (16 MiB v5e / 32 MiB v6e,v7x), below
# the 64 MiB physical VMEM of v7x.
_VMEM_LIMIT = 48 * 1024 * 1024


def _round_up(x, m):
    return (x + m - 1) // m * m


# ----------------------------------------------------------------------------
# Runtime probe for pltpu.roll direction (so the corner-derivation-by-roll
# trick is robust regardless of rotate-amount sign convention).
# Must be first called outside jit (done eagerly in __main__).
# ----------------------------------------------------------------------------
@functools.lru_cache(maxsize=None)
def _roll_sign():
    def _probe(x_ref, o_ref):
        o_ref[...] = pltpu.roll(x_ref[...], 1, axis=1)

    x = jnp.broadcast_to(jnp.arange(128, dtype=jnp.float32)[None, :], (8, 128))
    y = pl.pallas_call(
        _probe, out_shape=jax.ShapeDtypeStruct((8, 128), jnp.float32))(x)
    # jnp.roll semantics: out[:, 1] == in[:, 0] == 0
    return 1 if float(np.asarray(y)[0, 1]) == 0.0 else -1


# ----------------------------------------------------------------------------
# Linear layer (y = x @ W^T + b), tiled over the row dimension.
# ----------------------------------------------------------------------------
def _linear_kernel(x_ref, w_ref, b_ref, o_ref):
    o_ref[...] = (
        jnp.dot(x_ref[...], w_ref[...], preferred_element_type=jnp.float32)
        + b_ref[...]
    ).astype(o_ref.dtype)


def linear_pallas(x2d, weight, bias, *, tile_m=256, out_dtype=jnp.float32):
    """x2d: (M, K); weight: (Nout, K) torch-style; bias: (Nout,)."""
    M, K = x2d.shape
    Nout = weight.shape[0]
    tm = min(tile_m, _round_up(M, 8))
    M_pad = _round_up(M, tm)
    if M_pad != M:
        x2d = jnp.pad(x2d, ((0, M_pad - M), (0, 0)))
    wT = jnp.transpose(weight)            # (K, Nout)
    b = bias.reshape(1, Nout)
    out = pl.pallas_call(
        _linear_kernel,
        out_shape=jax.ShapeDtypeStruct((M_pad, Nout), out_dtype),
        grid=(M_pad // tm,),
        in_specs=[
            pl.BlockSpec((tm, K), lambda i: (i, 0)),
            pl.BlockSpec((K, Nout), lambda i: (0, 0)),
            pl.BlockSpec((1, Nout), lambda i: (0, 0)),
        ],
        out_specs=pl.BlockSpec((tm, Nout), lambda i: (i, 0)),
        compiler_params=pltpu.CompilerParams(
            dimension_semantics=("parallel",),
            vmem_limit_bytes=_VMEM_LIMIT),
    )(x2d, wT, b)
    return out[:M] if M_pad != M else out


# ----------------------------------------------------------------------------
# Deformable-attention core kernel (with fused output projection).
#   grid = (N, num_q_tiles); levels / heads unrolled statically inside.
#   value_ref : (1, Len_in_pad, n_heads*d_head)  bf16, per-level 128-padded
#   locx/locy/logit_ref : (1, n_heads, tile_q, n_levels*n_points) f32
#   wout_ref  : (n_heads*d_head, d_model) f32   (output_proj weight, transposed)
#   bout_ref  : (1, d_model) f32
#   out_ref   : (1, tile_q, d_model) f32 (lane-dense single store)
# ----------------------------------------------------------------------------
def _deform_kernel(value_ref, locx_ref, locy_ref, logit_ref, wout_ref, bout_ref,
                   out_ref, *, levels, n_points, n_heads, d_head, roll_sign):
    P = n_points
    tile_q = out_ref.shape[1]

    # Per-head inputs + softmax over (levels * points); denominator on the EUP.
    locx_hs, locy_hs, attn_hs = [], [], []
    for h in range(n_heads):
        locx_hs.append(locx_ref[0, h])                  # (tile_q, L*P)
        locy_hs.append(locy_ref[0, h])
        logits = logit_ref[0, h]
        m = jnp.max(logits, axis=-1, keepdims=True)
        e = jnp.exp(logits - m)
        attn_hs.append(
            e * pl.reciprocal(jnp.sum(e, axis=-1, keepdims=True), approx=True))

    accs = [jnp.zeros((tile_q, d_head), jnp.float32) for _ in range(n_heads)]

    for li, (Hl, Wl, pstart, plen) in enumerate(levels):
        Hf, Wf = float(Hl), float(Wl)
        sl = slice(li * P, (li + 1) * P)
        # hoisted once per level (shared by all heads)
        col = jax.lax.broadcasted_iota(jnp.int32, (tile_q, plen), 1)

        for h in range(n_heads):
            # grid_sample(align_corners=False) pixel coords: loc*size - 0.5
            xs = locx_hs[h][:, sl] * Wf - 0.5            # (tile_q, P)
            ys = locy_hs[h][:, sl] * Hf - 0.5
            aw = attn_hs[h][:, sl]
            x0 = jnp.floor(xs)
            y0 = jnp.floor(ys)
            fx = xs - x0
            fy = ys - y0
            x0i = x0.astype(jnp.int32)
            y0i = y0.astype(jnp.int32)

            # base-corner (y0, x0) level-local index, folded into [0, plen)
            # (whenever any corner is in-bounds, idx0 >= -plen-1, so two
            #  conditional adds implement an exact mod).
            idx0 = y0i * Wl + x0i
            idx0 = jnp.where(idx0 < 0, idx0 + plen, idx0)
            idx0 = jnp.where(idx0 < 0, idx0 + plen, idx0)

            # one compare per sampling point (base corner only)
            onehots = [(idx0[:, p:p + 1] == col).astype(jnp.float32)
                       for p in range(P)]

            scatter = None
            corners = (
                (0, 0, (1.0 - fy) * (1.0 - fx)),
                (0, 1, (1.0 - fy) * fx),
                (1, 0, fy * (1.0 - fx)),
                (1, 1, fy * fx),
            )
            for dy, dx, wf in corners:
                cx = x0i + dx
                cy = y0i + dy
                valid = ((cx >= 0) & (cx <= Wl - 1) &
                         (cy >= 0) & (cy <= Hl - 1)).astype(jnp.float32)
                w = aw * wf * valid                      # (tile_q, P)
                corner_sc = onehots[0] * w[:, 0:1]
                for p in range(1, P):
                    corner_sc = corner_sc + onehots[p] * w[:, p:p + 1]
                # derive this corner from the base one-hot via an XLU rotation
                shift = (dy * Wl + dx) % plen
                if shift:
                    amt = shift if roll_sign == 1 else plen - shift
                    corner_sc = pltpu.roll(corner_sc, amt, axis=1)
                scatter = corner_sc if scatter is None else scatter + corner_sc

            # level-local value slab (static 128-aligned slice), bf16 MXU dot.
            v_l = value_ref[0, pstart:pstart + plen,
                            h * d_head:(h + 1) * d_head]  # (plen, d_head)
            accs[h] = accs[h] + jnp.dot(scatter.astype(v_l.dtype), v_l,
                                        preferred_element_type=jnp.float32)

    # fused output projection + bias; single lane-dense (tile_q, d_model) store.
    concat = jnp.concatenate(accs, axis=-1)               # (tile_q, H*d_head) f32
    proj = jnp.dot(concat, wout_ref[...], preferred_element_type=jnp.float32)
    out_ref[0] = (proj + bout_ref[...]).astype(out_ref.dtype)


def deform_core(value_pad, locx, locy, logits, w_out_t, b_out, level_info, *,
                n_points, tile_q):
    N, Len_in_pad, nHdh = value_pad.shape
    _, n_heads, Lq_pad, LP = locx.shape
    d_model = w_out_t.shape[1]
    d_head = nHdh // n_heads
    nq = Lq_pad // tile_q

    kernel = functools.partial(
        _deform_kernel, levels=tuple(level_info), n_points=n_points,
        n_heads=n_heads, d_head=d_head, roll_sign=_roll_sign())

    return pl.pallas_call(
        kernel,
        out_shape=jax.ShapeDtypeStruct((N, Lq_pad, d_model), jnp.float32),
        grid=(N, nq),
        in_specs=[
            pl.BlockSpec((1, Len_in_pad, nHdh), lambda b, q: (b, 0, 0)),
            pl.BlockSpec((1, n_heads, tile_q, LP), lambda b, q: (b, 0, q, 0)),
            pl.BlockSpec((1, n_heads, tile_q, LP), lambda b, q: (b, 0, q, 0)),
            pl.BlockSpec((1, n_heads, tile_q, LP), lambda b, q: (b, 0, q, 0)),
            pl.BlockSpec((nHdh, d_model), lambda b, q: (0, 0)),
            pl.BlockSpec((1, d_model), lambda b, q: (0, 0)),
        ],
        out_specs=pl.BlockSpec((1, tile_q, d_model), lambda b, q: (b, q, 0)),
        compiler_params=pltpu.CompilerParams(
            dimension_semantics=("parallel", "parallel"),
            vmem_limit_bytes=_VMEM_LIMIT),
    )(value_pad, locx, locy, logits, w_out_t, b_out)


# ----------------------------------------------------------------------------
# Parameter initialization (mirrors MSDeformAttn._reset_parameters)
# ----------------------------------------------------------------------------
def xavier_uniform(key, shape):
    fan_out, fan_in = shape
    bound = math.sqrt(6.0 / (fan_in + fan_out))
    return jax.random.uniform(key, shape, jnp.float32, -bound, bound)


def init_params(key, d_model, d_head, n_levels, n_heads, n_points):
    kv, ko = jax.random.split(key)
    thetas = jnp.arange(n_heads, dtype=jnp.float32) * (2.0 * math.pi / n_heads)
    grid = jnp.stack([jnp.cos(thetas), jnp.sin(thetas)], -1)            # (H, 2)
    grid = grid / jnp.max(jnp.abs(grid), axis=-1, keepdims=True)
    grid = jnp.tile(grid.reshape(n_heads, 1, 1, 2), (1, n_levels, n_points, 1))
    scale = jnp.arange(1, n_points + 1, dtype=jnp.float32).reshape(1, 1, n_points, 1)
    grid = grid * scale                                                 # (H, L, P, 2)
    return dict(
        sampling_offsets_w=jnp.zeros((n_heads * n_levels * n_points * 2, d_model),
                                     jnp.float32),
        sampling_offsets_b=grid.reshape(-1),
        attention_weights_w=jnp.zeros((n_heads * n_levels * n_points, d_model),
                                      jnp.float32),
        attention_weights_b=jnp.zeros((n_heads * n_levels * n_points,), jnp.float32),
        value_proj_w=xavier_uniform(kv, (n_heads * d_head, d_model)),
        value_proj_b=jnp.zeros((n_heads * d_head,), jnp.float32),
        output_proj_w=xavier_uniform(ko, (d_model, n_heads * d_head)),
        output_proj_b=jnp.zeros((d_model,), jnp.float32),
    )


# ----------------------------------------------------------------------------
# Full forward (glue in JAX, hot paths in Pallas).
# input_spatial_shapes / input_level_start_index must be static host values.
# ----------------------------------------------------------------------------
def ms_deform_attn_forward(params, query, reference_points, input_flatten,
                           input_spatial_shapes, input_level_start_index,
                           input_padding_mask=None, *,
                           n_heads, d_head, n_levels, n_points,
                           tile_q=128, core_dtype=jnp.bfloat16):
    N, Len_q, C = query.shape
    _, Len_in, _ = input_flatten.shape
    shapes = np.asarray(input_spatial_shapes).astype(np.int64)   # static (L, 2)
    starts = np.asarray(input_level_start_index).astype(np.int64)
    assert int((shapes[:, 0] * shapes[:, 1]).sum()) == Len_in

    nHdh = n_heads * d_head
    LP = n_levels * n_points

    # --- value projection (tiled Pallas GEMM, writes bf16 directly) ---
    value = linear_pallas(input_flatten.reshape(N * Len_in, C),
                          params["value_proj_w"], params["value_proj_b"],
                          tile_m=512, out_dtype=core_dtype)
    value = value.reshape(N, Len_in, nHdh)
    if input_padding_mask is not None:
        value = jnp.where(input_padding_mask[..., None],
                          jnp.zeros((), value.dtype), value)

    # --- per-level 128-lane-aligned padded value layout ---
    level_info, chunks, cur = [], [], 0
    for l in range(n_levels):
        Hl, Wl, st = int(shapes[l, 0]), int(shapes[l, 1]), int(starts[l])
        n_tok = Hl * Wl
        plen = _round_up(n_tok, 128)
        chunk = value[:, st:st + n_tok, :]
        if plen != n_tok:
            chunk = jnp.pad(chunk, ((0, 0), (0, plen - n_tok), (0, 0)))
        chunks.append(chunk)
        level_info.append((Hl, Wl, cur, plen))
        cur += plen
    value_pad = jnp.concatenate(chunks, axis=1)

    # --- fused query-side projection: sampling offsets + attention logits ---
    q_w = jnp.concatenate([params["sampling_offsets_w"],
                           params["attention_weights_w"]], axis=0)
    q_b = jnp.concatenate([params["sampling_offsets_b"],
                           params["attention_weights_b"]], axis=0)
    qp = linear_pallas(query.reshape(N * Len_q, C), q_w, q_b)
    off = qp[:, :LP * n_heads * 2].reshape(N, Len_q, n_heads, n_levels, n_points, 2)
    logits = qp[:, LP * n_heads * 2:]

    # --- sampling offsets -> absolute sampling locations (precomputed) ---
    if reference_points.shape[-1] == 2:
        norm = jnp.array([[float(shapes[l, 1]), float(shapes[l, 0])]
                          for l in range(n_levels)], jnp.float32)       # (L,2)=(W,H)
        loc = (reference_points[:, :, None, :, None, :]
               + off / norm[None, None, None, :, None, :])
    elif reference_points.shape[-1] == 4:
        loc = (reference_points[:, :, None, :, None, :2]
               + off / n_points * reference_points[:, :, None, :, None, 2:] * 0.5)
    else:
        raise ValueError("Last dim of reference_points must be 2 or 4")
    locx = jnp.transpose(loc[..., 0], (0, 2, 1, 3, 4)).reshape(N, n_heads, Len_q, LP)
    locy = jnp.transpose(loc[..., 1], (0, 2, 1, 3, 4)).reshape(N, n_heads, Len_q, LP)

    # --- attention weight logits (softmax happens inside the core kernel) ---
    logits = jnp.transpose(logits.reshape(N, Len_q, n_heads, LP), (0, 2, 1, 3))

    # --- pad Len_q to a multiple of the query tile ---
    tq = min(tile_q, _round_up(Len_q, 8))
    Lq_pad = _round_up(Len_q, tq)
    if Lq_pad != Len_q:
        pad = ((0, 0), (0, 0), (0, Lq_pad - Len_q), (0, 0))
        locx = jnp.pad(locx, pad)
        locy = jnp.pad(locy, pad)
        logits = jnp.pad(logits, pad)

    # --- deformable core with fused output projection ---
    w_out_t = jnp.transpose(params["output_proj_w"])     # (H*d_head, d_model)
    b_out = params["output_proj_b"].reshape(1, -1)
    out = deform_core(value_pad, locx, locy, logits, w_out_t, b_out, level_info,
                      n_points=n_points, tile_q=tq)      # (N, Lq_pad, d_model)
    out = out[:, :Len_q, :]
    # TODO(synk): out_sample_loc=True extra return (sampling_locations ++ attn
    # weights) is plain reshape glue and is not emitted here (module default False).
    return out, None


# ----------------------------------------------------------------------------
# Pure-JAX reference (grid_sample align_corners=False, padding_mode=zeros)
# ----------------------------------------------------------------------------
def reference_forward(params, query, reference_points, input_flatten,
                      spatial_shapes, level_start, *,
                      n_heads, d_head, n_levels, n_points):
    N, Len_q, C = query.shape
    _, Len_in, _ = input_flatten.shape
    ss = np.asarray(spatial_shapes)
    ls = np.asarray(level_start)

    value = input_flatten @ params["value_proj_w"].T + params["value_proj_b"]
    value = value.reshape(N, Len_in, n_heads, d_head)

    off = query @ params["sampling_offsets_w"].T + params["sampling_offsets_b"]
    off = off.reshape(N, Len_q, n_heads, n_levels, n_points, 2)
    logits = query @ params["attention_weights_w"].T + params["attention_weights_b"]
    attn = jax.nn.softmax(
        logits.reshape(N, Len_q, n_heads, n_levels * n_points), axis=-1
    ).reshape(N, Len_q, n_heads, n_levels, n_points)

    norm = jnp.stack([spatial_shapes[..., 1], spatial_shapes[..., 0]], -1
                     ).astype(jnp.float32)
    loc = (reference_points[:, :, None, :, None, :]
           + off / norm[None, None, None, :, None, :])  # (N, Lq, H, L, P, 2)

    out = jnp.zeros((N, Len_q, n_heads, d_head), jnp.float32)
    for l in range(n_levels):
        Hl, Wl, st = int(ss[l, 0]), int(ss[l, 1]), int(ls[l])
        v_l = value[:, st:st + Hl * Wl].reshape(N, Hl, Wl, n_heads, d_head)
        x = loc[:, :, :, l, :, 0] * Wl - 0.5            # (N, Lq, H, P)
        y = loc[:, :, :, l, :, 1] * Hl - 0.5
        x0 = jnp.floor(x); y0 = jnp.floor(y)
        lx = x - x0; ly = y - y0
        x0i = x0.astype(jnp.int32); y0i = y0.astype(jnp.int32)
        n_idx = jnp.arange(N)[:, None, None, None]
        h_idx = jnp.arange(n_heads)[None, None, :, None]
        for dy, dx, wf in ((0, 0, (1 - ly) * (1 - lx)), (0, 1, (1 - ly) * lx),
                           (1, 0, ly * (1 - lx)), (1, 1, ly * lx)):
            cx = x0i + dx; cy = y0i + dy
            valid = (cx >= 0) & (cx < Wl) & (cy >= 0) & (cy < Hl)
            cxc = jnp.clip(cx, 0, Wl - 1); cyc = jnp.clip(cy, 0, Hl - 1)
            samp = v_l[n_idx, cyc, cxc, h_idx]          # (N, Lq, H, P, d_head)
            w = (attn[:, :, :, l, :] * wf * valid.astype(jnp.float32))[..., None]
            out = out + jnp.sum(w * samp, axis=3)
    out = out.reshape(N, Len_q, n_heads * d_head)
    return out @ params["output_proj_w"].T + params["output_proj_b"]


# ----------------------------------------------------------------------------
if __name__ == "__main__":
    d_model, d_head, n_levels, n_heads, n_points = 32, 8, 2, 4, 4
    N, Len_q = 2, 8
    spatial_shapes = jnp.array([[8, 8], [4, 4]], dtype=jnp.int32)
    level_start = jnp.array([0, 64], dtype=jnp.int32)
    Len_in = 80

    key = jax.random.PRNGKey(0)
    k1, k2, k3, kp = jax.random.split(key, 4)
    query = jax.random.normal(k1, (N, Len_q, d_model), jnp.float32)
    input_flatten = jax.random.normal(k2, (N, Len_in, d_model), jnp.float32)
    reference_points = jax.random.uniform(k3, (N, Len_q, n_levels, 2), jnp.float32)

    params = init_params(kp, d_model, d_head, n_levels, n_heads, n_points)

    _roll_sign()   # warm the roll-direction probe eagerly (outside any jit)

    out, _ = ms_deform_attn_forward(
        params, query, reference_points, input_flatten,
        spatial_shapes, level_start, None,
        n_heads=n_heads, d_head=d_head, n_levels=n_levels, n_points=n_points)
    out = jax.block_until_ready(out)

    ref = reference_forward(
        params, query, reference_points, input_flatten,
        spatial_shapes, level_start,
        n_heads=n_heads, d_head=d_head, n_levels=n_levels, n_points=n_points)
    ref = jax.block_until_ready(ref)

    # bf16 MXU core + approx reciprocal softmax -> slightly looser tolerance.
    np.testing.assert_allclose(np.asarray(out), np.asarray(ref),
                               rtol=3e-2, atol=3e-2)
    print("KERNEL_OK")
</pallas_src>

<mosaic_0001>
module attributes {stable_mosaic.version = 11 : i64} {
  func.func @_probe(%arg0: memref<8x128xf32, #tpu.memory_space<vmem>>, %arg1: memref<8x128xf32, #tpu.memory_space<vmem>>) attributes {dimension_semantics = [], scalar_prefetch = 0 : i64, scratch_operands = 0 : i64, tpu.core_type = #tpu.core_type<tc>} {
    %c0 = arith.constant 0 : index
    %c0_0 = arith.constant 0 : index
    %0 = vector.load %arg0[%c0, %c0_0] : memref<8x128xf32, #tpu.memory_space<vmem>>, vector<8x128xf32>
    %c1_i32 = arith.constant 1 : i32
    %1 = tpu.dynamic_rotate %0 by %c1_i32 dim 1 : vector<8x128xf32>, i32 -> vector<8x128xf32>
    %c0_1 = arith.constant 0 : index
    %c0_2 = arith.constant 0 : index
    %2 = vector.load %arg1[%c0_1, %c0_2] : memref<8x128xf32, #tpu.memory_space<vmem>>, vector<8x128xf32>
    tpu.vector_store %arg1[%c0_1, %c0_2], %1 {strides = array<i32>} : memref<8x128xf32, #tpu.memory_space<vmem>>, vector<8x128xf32>,
    return
  }
}

</mosaic_0001>

<bundles_post_ra>
// kernel: tpu_custom_call.1
= control target key start
LH: loop header
LB: loop body
LE: loop exit
PB: predicated region body
PF: predicated region fallthrough
CT: control target
= control target key end

     0   :  { %6 = vsyncpa [#allocation3], 0  ;;  %s118_s0 = inlined_call_operand.hbm [shape: f32[8,128], index: 0, kind: input, shape index: {}]   ;;  %s119_s1 = inlined_call_operand.hbm [shape: f32[8,128], index: 1, kind: output, shape index: {}]  }
   0x1   :  { %7 = vsyncpa [#allocation4], 0  ;;  %s13_s8 = sshll.u32 %s118_s0, 4  ;;  %s99_s9 = smov [#allocation2]   ;;  %s14_s8 = int_to_ptr.hbm [resolvable:$true] %s13_s8 }
   0x2   :  { %s15_s10 = sshll.u32 %s99_s9, 4  ;;  %s16_s10 = int_to_ptr.vmem [resolvable:$true] %s15_s10 }
   0x3   :  { %18 = dma.hbm_to_vmem [thread:$0]  %s14_s8, 128, %s16_s10, [#allocation3]  }
   0x4   :  { %95 = dma.done.wait [#allocation3], 128  }
   0x5   :  { %96 = vsyncadd [#allocation3], 4294967168  ;;  %v23_v0 = vld [vmem:[#allocation2] sm:$0xff]  ;;  %s100_s11 = smov 1   ;;  %s101_s12 = smov [#allocation5]  }
   0x6   :  { %24 = vrot.lane.b32.xlu0 %v23_v0, %s100_s11  ;;  %s32_s13 = sshll.u32 %s101_s12, 4  ;;  %s34_s16 = sshll.u32 %s119_s1, 4  ;;  %s33_s13 = int_to_ptr.vmem [resolvable:$true] %s32_s13  ;;  %s35_s16 = int_to_ptr.hbm [resolvable:$true] %s34_s16 }
  0x78   :  { %v25_v1 = vpop.permute.xlu0 %24 }
  0x79   :  { %26 = vst [vmem:[#allocation5] sm:$0xff] %v25_v1 }
  0x7a   :  { %37 = dma.vmem_to_hbm [thread:$0]  %s33_s13, 128, %s35_s16, [#allocation4]  }
  0x7b   :  { %97 = dma.done.wait [#allocation4], 128  }
  0x7c   :  { %98 = vsyncadd [#allocation4], 4294967168 }
  0x7d   :  { %42 = vsyncpa [#allocation3], 1 }
  0x7e   :  { %43 = vsyncpa [#allocation4], 1 }

</bundles_post_ra>
